<compile_context>
chip_gen: v5e
topology: v5e:2x2
jax: 0.10.0
libtpu: 0.0.40
codegen_flags: <defaults>
</compile_context>

<pallas_src>
import numpy as np
import jax
import jax.numpy as jnp
from jax.experimental import pallas as pl
from jax.experimental.pallas import tpu as pltpu


# --------------------------------------------------------------------------
# helpers
# --------------------------------------------------------------------------
def _round_up(n: int, m: int) -> int:
    return ((n + m - 1) // m) * m


def _cdiv(a: int, b: int) -> int:
    return (a + b - 1) // b


def _device_traits():
    """Generation-aware knobs: (vmem_limit_bytes, two_tensorcores, bf16_eup)."""
    vmem_cap = 64 * 1024 * 1024                     # conservative fallback (v7x)
    try:
        vmem_cap = int(pltpu.get_tpu_info().vmem_capacity_bytes)
    except Exception:
        pass
    # ~3/4 of physical VMEM: ~96-100 MiB on v5e/v6e (128 MiB), ~48 MiB on v7x.
    vmem_limit = min((vmem_cap * 3) // 4, 100 * 1024 * 1024)
    dk = ""
    try:
        dk = jax.devices()[0].device_kind.lower()
    except Exception:
        pass
    two_tc = ("v7" in dk) or ("7x" in dk) or ("tpu7" in dk)
    bf16_eup = ("v6" in dk) or two_tc               # v5e and older: no bf16 EUP/VPU
    return vmem_limit, two_tc, bf16_eup


# --------------------------------------------------------------------------
# Pallas kernel
# --------------------------------------------------------------------------
def _make_go_kernel(num_layers: int, residual: bool, bf16_intermediate: bool):
    """Fused kernel: num_layers of tanh(x@W+b), bf16 MXU operands / f32 acc."""

    def kernel(*refs):
        x_ref = refs[0]
        o_ref = refs[-1]
        p = refs[1:-1]                       # interleaved (W bf16, b f32) pairs

        x16 = x_ref[...].astype(jnp.bfloat16)
        h16 = x16
        out32 = None
        for l in range(num_layers):
            w = p[2 * l][...]                # (K, N) bf16
            b = p[2 * l + 1][...]            # (1, N) f32
            acc = jnp.dot(h16, w, preferred_element_type=jnp.float32)
            if l < num_layers - 1 and bf16_intermediate:
                # bf16 EUP tanh (v6e/v7x): result is recast to bf16 for the
                # next matmul anyway, so precision impact is negligible.
                h16 = jnp.tanh((acc + b).astype(jnp.bfloat16))
            else:
                out32 = jnp.tanh(acc + b)    # f32 epilogue (always for last layer)
                h16 = out32.astype(jnp.bfloat16)

        out = out32
        if residual:
            wr = p[2 * num_layers][...]
            br = p[2 * num_layers + 1][...]
            # residual BlockSparseLinear uses Identity activation
            out = out + jnp.dot(x16, wr, preferred_element_type=jnp.float32) + br
        o_ref[...] = out.astype(o_ref.dtype)

    return kernel


# --------------------------------------------------------------------------
# wrapper
# --------------------------------------------------------------------------
def go_embedding_forward(x, layer_params, residual_params=None, *, tb=None):
    """Fused GOEmbeddingLayer forward with a Pallas TPU kernel.

    x:               (B, F_in); bf16 preferred (f32 is cast in the wrapper)
    layer_params:    list of (W_l (F_l_in, F_l_out), b_l (1, F_l_out))
    residual_params: optional (W_r (F_in, F_out), b_r (1, F_out))
    Returns (B, F_out) in x.dtype.
    """
    B, F_in = x.shape
    num_layers = len(layer_params)
    residual = residual_params is not None
    dims = [F_in] + [w.shape[1] for w, _ in layer_params]
    F_out = dims[-1]
    out_dtype = x.dtype

    vmem_limit, two_tc, bf16_eup = _device_traits()

    # bf16 weights / f32 biases; no lane padding (full-extent last BlockSpec
    # dims are legal and the MXU handles ragged K/N internally).
    params_flat = []
    for w, b in layer_params:
        params_flat.append(jnp.asarray(w, jnp.bfloat16))
        params_flat.append(jnp.asarray(b, jnp.float32).reshape(1, -1))
    if residual:
        wr, br = residual_params
        params_flat.append(jnp.asarray(wr, jnp.bfloat16))
        params_flat.append(jnp.asarray(br, jnp.float32).reshape(1, -1))

    # VMEM footprint of the resident params (internal (sublane,128) tiling).
    def _vmem_bytes(a):
        r, c = a.shape
        sub = 16 if a.dtype == jnp.bfloat16 else 8
        return _round_up(max(r, 1), sub) * _round_up(c, 128) * a.dtype.itemsize
    weight_bytes = sum(_vmem_bytes(p) for p in params_flat)

    max_w = max(dims)
    out_it = jnp.dtype(out_dtype).itemsize
    # 2x-buffered bf16 x tile + 2x-buffered out tile + f32/bf16 intermediates.
    per_row = (4 * _round_up(F_in, 128)
               + 2 * out_it * _round_up(F_out, 128)
               + 12 * _round_up(max_w, 128))

    if weight_bytes + 8 * per_row > vmem_limit:
        # TODO(synk): production GO sizes (thousands of genes/terms) need
        #             K/N-tiled weights (pl.Buffered weight BlockSpecs +
        #             f32 accumulator scratch, skipping all-zero blocks via
        #             scalar-prefetched offset tables) instead of the
        #             fully-resident VMEM weights used here.
        raise ValueError(
            f"resident weights ({weight_bytes} B) exceed the VMEM budget "
            f"({vmem_limit} B); tiled-weight fallback not implemented.")

    B8 = _round_up(B, 8)
    if tb is None:
        avail = vmem_limit - weight_bytes
        tb = max(8, min(2048, (int(avail // per_row) // 8) * 8))
    tb = max(8, min(_round_up(int(tb), 8), B8))

    steps = _cdiv(B8, tb)
    if two_tc:
        # keep both v7x TensorCores fed with an EVEN number of grid steps,
        # but only when the per-step payload amortizes the ~0.35us step cost.
        if steps == 1 and B8 >= 16:
            half = _round_up(_cdiv(B8, 2), 8)
            if half < B8 and half * (2 * F_in + out_it * F_out) >= (2 << 20):
                tb, steps = half, 2
        elif steps > 1 and steps % 2 == 1:
            tb_try = max(8, _round_up(_cdiv(B8, steps + 1), 8))
            if _cdiv(B8, tb_try) % 2 == 0:
                tb = tb_try
                steps = _cdiv(B8, tb_try)

    # Stream activations as bf16; pad the batch only to a multiple of 8.
    x_in = x if x.dtype == jnp.bfloat16 else x.astype(jnp.bfloat16)
    if B8 != B:
        x_in = jnp.pad(x_in, ((0, B8 - B), (0, 0)))

    kernel = _make_go_kernel(num_layers, residual, bf16_eup)

    in_specs = [pl.BlockSpec((tb, F_in), lambda i: (i, 0))]
    # Grid-constant params: fully resident in VMEM, single copy (no pipelining).
    in_specs += [pl.BlockSpec(memory_space=pltpu.MemorySpace.VMEM)
                 for _ in params_flat]
    out_specs = pl.BlockSpec((tb, F_out), lambda i: (i, 0))

    y = pl.pallas_call(
        kernel,
        out_shape=jax.ShapeDtypeStruct((B8, F_out), out_dtype),
        grid_spec=pl.GridSpec(grid=(steps,), in_specs=in_specs,
                              out_specs=out_specs),
        compiler_params=pltpu.CompilerParams(
            dimension_semantics=("parallel",),
            vmem_limit_bytes=int(vmem_limit)),
    )(x_in, *params_flat)

    return y if B8 == B else y[:B]


# --------------------------------------------------------------------------
# Deterministic parameter construction (mirrors GOEmbeddingLayer.__init__)
# --------------------------------------------------------------------------
def _init_block_sparse(key, in_blocks, out_blocks, block_structure,
                       block_structure_pos=(), block_structure_neg=()):
    """Masked-dense parameters for one BlockSparseLinear."""
    f_in, f_out = int(sum(in_blocks)), int(sum(out_blocks))
    in_off = np.concatenate([[0], np.cumsum(in_blocks)]).astype(int)
    out_off = np.concatenate([[0], np.cumsum(out_blocks)]).astype(int)

    kw, kb = jax.random.split(key)
    bound = 1.0 / np.sqrt(max(f_in, 1))
    w = jax.random.uniform(kw, (f_in, f_out), jnp.float32, -bound, bound)
    b = jax.random.uniform(kb, (1, f_out), jnp.float32, -bound, bound)

    mask = np.zeros((f_in, f_out), np.float32)
    pos_m = np.zeros((f_in, f_out), np.float32)
    neg_m = np.zeros((f_in, f_out), np.float32)
    for (i, j) in list(block_structure) + list(block_structure_pos) + list(block_structure_neg):
        mask[in_off[i]:in_off[i + 1], out_off[j]:out_off[j + 1]] = 1.0
    for (i, j) in block_structure_pos:
        pos_m[in_off[i]:in_off[i + 1], out_off[j]:out_off[j + 1]] = 1.0
    for (i, j) in block_structure_neg:
        neg_m[in_off[i]:in_off[i + 1], out_off[j]:out_off[j + 1]] = 1.0

    w = jnp.where(jnp.asarray(pos_m) > 0, jnp.abs(w), w)
    w = jnp.where(jnp.asarray(neg_m) > 0, -jnp.abs(w), w)
    w = w * jnp.asarray(mask)
    return w, b


def build_go_embedding_params(key, num_layers, in_blocks, out_blocks,
                              block_structure,
                              block_structure_pos=(), block_structure_neg=(),
                              intermediate_scaling=1.0,
                              intermediate_mode="out_out",
                              residual=False):
    """Port of GOEmbeddingLayer.__init__ block-shape logic; returns params."""
    if not isinstance(intermediate_scaling, list):
        if num_layers == 1:
            intermediate_scaling = [intermediate_scaling]
        else:
            intermediate_scaling = [intermediate_scaling] * (num_layers - 1)

    keys = jax.random.split(key, num_layers + 1)
    layer_params = []

    if intermediate_mode == "in_in":
        diag_in = [(i, i) for i in range(len(in_blocks))]
    elif intermediate_mode == "out_out":
        diag_out = [(i, i) for i in range(len(out_blocks))]

    if num_layers == 1:
        layer_params.append(_init_block_sparse(
            keys[0], in_blocks, out_blocks, block_structure,
            block_structure_pos, block_structure_neg))
    else:
        if intermediate_mode == "in_in":
            in_scaled = None
            for layer in range(num_layers):
                if layer == 0:
                    s = intermediate_scaling[layer]
                    in_scaled = [int(i * s) for i in in_blocks]
                    p = _init_block_sparse(keys[layer], in_blocks, in_scaled, diag_in)
                elif layer == num_layers - 1:
                    p = _init_block_sparse(keys[layer], in_scaled, out_blocks,
                                           block_structure,
                                           block_structure_pos, block_structure_neg)
                else:
                    s = intermediate_scaling[layer]
                    in_scaled_new = [int(i * s) for i in in_blocks]
                    p = _init_block_sparse(keys[layer], in_scaled, in_scaled_new, diag_in)
                    in_scaled = in_scaled_new
                layer_params.append(p)
        elif intermediate_mode == "out_out":
            out_scaled = None
            for layer in range(num_layers):
                if layer == 0:
                    s = intermediate_scaling[layer]
                    out_scaled = [int(o * s) for o in out_blocks]
                    p = _init_block_sparse(keys[layer], in_blocks, out_scaled,
                                           block_structure,
                                           block_structure_pos, block_structure_neg)
                elif layer == num_layers - 1:
                    p = _init_block_sparse(keys[layer], out_scaled, out_blocks, diag_out)
                else:
                    s = intermediate_scaling[layer]
                    out_scaled_new = [int(o * s) for o in out_blocks]
                    p = _init_block_sparse(keys[layer], out_scaled, out_scaled_new, diag_out)
                    out_scaled = out_scaled_new
                layer_params.append(p)
        elif intermediate_mode == "in_out":
            ham_scaled = None
            for layer in range(num_layers):
                if layer == 0:
                    s = intermediate_scaling[layer]
                    ham_scaled = [int(s) for _ in block_structure]
                    in_ham = [(i, k) for k, (i, j) in enumerate(block_structure)]
                    p = _init_block_sparse(keys[layer], in_blocks, ham_scaled, in_ham)
                elif layer == num_layers - 1:
                    ham_out = [(k, j) for k, (i, j) in enumerate(block_structure)]
                    ham_out_p = [(k, j) for k, (i, j) in enumerate(block_structure_pos)]
                    ham_out_n = [(k, j) for k, (i, j) in enumerate(block_structure_neg)]
                    p = _init_block_sparse(keys[layer], ham_scaled, out_blocks,
                                           ham_out, ham_out_p, ham_out_n)
                else:
                    s = intermediate_scaling[layer]
                    ham_scaled_new = [int(s) for _ in block_structure]
                    ham_ham = [(k, k) for k, _ in enumerate(block_structure)]
                    p = _init_block_sparse(keys[layer], ham_scaled, ham_scaled_new, ham_ham)
                    ham_scaled = ham_scaled_new
                layer_params.append(p)
        else:
            raise ValueError(f"unknown intermediate_mode {intermediate_mode}")

    residual_params = None
    if residual:
        residual_params = _init_block_sparse(
            keys[-1], in_blocks, out_blocks, block_structure,
            block_structure_pos, block_structure_neg)

    return layer_params, residual_params


# --------------------------------------------------------------------------
# Pure-JAX reference (matches the kernel's bf16-operand / f32-acc numerics)
# --------------------------------------------------------------------------
def reference_forward(x, layer_params, residual_params=None, *,
                      bf16_intermediate=False):
    x16 = x.astype(jnp.bfloat16)
    h16 = x16
    out = None
    n = len(layer_params)
    for l, (w, b) in enumerate(layer_params):
        acc = jnp.dot(h16, w.astype(jnp.bfloat16),
                      preferred_element_type=jnp.float32)
        if l < n - 1 and bf16_intermediate:
            h16 = jnp.tanh((acc + b).astype(jnp.bfloat16))
        else:
            out = jnp.tanh(acc + b)
            h16 = out.astype(jnp.bfloat16)
    if residual_params is not None:
        wr, br = residual_params
        out = out + jnp.dot(x16, wr.astype(jnp.bfloat16),
                            preferred_element_type=jnp.float32) + br
    return out


# --------------------------------------------------------------------------
# Demo
# --------------------------------------------------------------------------
if __name__ == "__main__":
    key = jax.random.PRNGKey(0)
    k_param, k_x = jax.random.split(key)

    # Small GO-style config: 3 input blocks (genes grouped), 2 output GO terms.
    in_blocks = [8, 8, 16]      # F_in = 32
    out_blocks = [16, 16]       # F_out = 32
    block_structure = [(0, 0), (1, 0), (1, 1), (2, 1)]
    num_layers = 2
    intermediate_scaling = 2
    intermediate_mode = "out_out"
    residual = True

    layer_params, residual_params = build_go_embedding_params(
        k_param, num_layers, in_blocks, out_blocks, block_structure,
        intermediate_scaling=intermediate_scaling,
        intermediate_mode=intermediate_mode,
        residual=residual,
    )

    B = 64
    x = jax.random.normal(k_x, (B, sum(in_blocks)), jnp.float32)

    y = go_embedding_forward(x, layer_params, residual_params)
    jax.block_until_ready(y)

    bf16_eup = _device_traits()[2]
    y_ref = reference_forward(x, layer_params, residual_params,
                              bf16_intermediate=bf16_eup)
    assert y.shape == (B, sum(out_blocks))
    np.testing.assert_allclose(np.asarray(y, np.float32),
                               np.asarray(y_ref, np.float32),
                               rtol=1e-2, atol=1e-2)
    print("KERNEL_OK")
</pallas_src>

<mosaic_0001>
module attributes {stable_mosaic.version = 11 : i64} {
  func.func @kernel(%arg0: i32, %arg1: memref<64x32xbf16, #tpu.memory_space<vmem>>, %arg2: memref<32x64xbf16, #tpu.memory_space<vmem>>, %arg3: memref<1x64xf32, #tpu.memory_space<vmem>>, %arg4: memref<64x32xbf16, #tpu.memory_space<vmem>>, %arg5: memref<1x32xf32, #tpu.memory_space<vmem>>, %arg6: memref<32x32xbf16, #tpu.memory_space<vmem>>, %arg7: memref<1x32xf32, #tpu.memory_space<vmem>>, %arg8: memref<64x32xf32, #tpu.memory_space<vmem>>) attributes {dimension_semantics = [#tpu.dimension_semantics<parallel>], iteration_bounds = array<i64: 1>, scalar_prefetch = 0 : i64, scratch_operands = 0 : i64, tpu.core_type = #tpu.core_type<tc>, window_params = [{transform_indices = @transform_0, window_bounds = array<i64: 64, 32>}, {pipeline_mode = #tpu.pipeline_mode<synchronous>, transform_indices = @transform_1, window_bounds = array<i64: 32, 64>}, {pipeline_mode = #tpu.pipeline_mode<synchronous>, transform_indices = @transform_2, window_bounds = array<i64: 1, 64>}, {pipeline_mode = #tpu.pipeline_mode<synchronous>, transform_indices = @transform_3, window_bounds = array<i64: 64, 32>}, {pipeline_mode = #tpu.pipeline_mode<synchronous>, transform_indices = @transform_4, window_bounds = array<i64: 1, 32>}, {pipeline_mode = #tpu.pipeline_mode<synchronous>, transform_indices = @transform_5, window_bounds = array<i64: 32, 32>}, {pipeline_mode = #tpu.pipeline_mode<synchronous>, transform_indices = @transform_6, window_bounds = array<i64: 1, 32>}, {transform_indices = @transform_7, window_bounds = array<i64: 64, 32>}]} {
    %c0 = arith.constant 0 : index
    %c0_0 = arith.constant 0 : index
    %0 = vector.load %arg1[%c0, %c0_0] : memref<64x32xbf16, #tpu.memory_space<vmem>>, vector<64x32xbf16>
    %c0_1 = arith.constant 0 : index
    %c0_2 = arith.constant 0 : index
    %1 = vector.load %arg2[%c0_1, %c0_2] : memref<32x64xbf16, #tpu.memory_space<vmem>>, vector<32x64xbf16>
    %c0_3 = arith.constant 0 : index
    %c0_4 = arith.constant 0 : index
    %2 = vector.load %arg3[%c0_3, %c0_4] : memref<1x64xf32, #tpu.memory_space<vmem>>, vector<1x64xf32>
    %cst = arith.constant dense<0.000000e+00> : vector<64x64xf32>
    %3 = tpu.matmul %0, %1, %cst {dimension_numbers = #tpu.dot_dimension_numbers<[1], [0], [0], [1], [0, 0, 1, 1], [], []>} : vector<64x32xbf16>, vector<32x64xbf16>, vector<64x64xf32> -> vector<64x64xf32>
    %4 = vector.broadcast %2 : vector<1x64xf32> to vector<64x64xf32>
    %5 = arith.addf %3, %4 : vector<64x64xf32>
    %6 = math.tanh %5 : vector<64x64xf32>
    %7 = arith.truncf %6 : vector<64x64xf32> to vector<64x64xbf16>
    %c0_5 = arith.constant 0 : index
    %c0_6 = arith.constant 0 : index
    %8 = vector.load %arg4[%c0_5, %c0_6] : memref<64x32xbf16, #tpu.memory_space<vmem>>, vector<64x32xbf16>
    %c0_7 = arith.constant 0 : index
    %c0_8 = arith.constant 0 : index
    %9 = vector.load %arg5[%c0_7, %c0_8] : memref<1x32xf32, #tpu.memory_space<vmem>>, vector<1x32xf32>
    %cst_9 = arith.constant dense<0.000000e+00> : vector<64x32xf32>
    %10 = tpu.matmul %7, %8, %cst_9 {dimension_numbers = #tpu.dot_dimension_numbers<[1], [0], [0], [1], [0, 0, 1, 1], [], []>} : vector<64x64xbf16>, vector<64x32xbf16>, vector<64x32xf32> -> vector<64x32xf32>
    %11 = vector.broadcast %9 : vector<1x32xf32> to vector<64x32xf32>
    %12 = arith.addf %10, %11 : vector<64x32xf32>
    %13 = math.tanh %12 : vector<64x32xf32>
    %c0_10 = arith.constant 0 : index
    %c0_11 = arith.constant 0 : index
    %14 = vector.load %arg6[%c0_10, %c0_11] : memref<32x32xbf16, #tpu.memory_space<vmem>>, vector<32x32xbf16>
    %c0_12 = arith.constant 0 : index
    %c0_13 = arith.constant 0 : index
    %15 = vector.load %arg7[%c0_12, %c0_13] : memref<1x32xf32, #tpu.memory_space<vmem>>, vector<1x32xf32>
    %cst_14 = arith.constant dense<0.000000e+00> : vector<64x32xf32>
    %16 = tpu.matmul %0, %14, %cst_14 {dimension_numbers = #tpu.dot_dimension_numbers<[1], [0], [0], [1], [0, 0, 1, 1], [], []>} : vector<64x32xbf16>, vector<32x32xbf16>, vector<64x32xf32> -> vector<64x32xf32>
    %17 = arith.addf %13, %16 : vector<64x32xf32>
    %18 = vector.broadcast %15 : vector<1x32xf32> to vector<64x32xf32>
    %19 = arith.addf %17, %18 : vector<64x32xf32>
    %c0_15 = arith.constant 0 : index
    %c0_16 = arith.constant 0 : index
    %20 = vector.load %arg8[%c0_15, %c0_16] : memref<64x32xf32, #tpu.memory_space<vmem>>, vector<64x32xf32>
    tpu.vector_store %arg8[%c0_15, %c0_16], %19 {strides = array<i32>} : memref<64x32xf32, #tpu.memory_space<vmem>>, vector<64x32xf32>,
    return
  }
  func.func @transform_0(%arg0: i32) -> (i32, i32) {
    %c0_i32 = arith.constant 0 : i32
    %c0_i32_0 = arith.constant 0 : i32
    return %arg0, %c0_i32 : i32, i32
  }
  func.func @transform_1(%arg0: i32) -> (i32, i32) {
    %c0_i32 = arith.constant 0 : i32
    %c0_i32_0 = arith.constant 0 : i32
    %c0_i32_1 = arith.constant 0 : i32
    return %c0_i32, %c0_i32_0 : i32, i32
  }
  func.func @transform_2(%arg0: i32) -> (i32, i32) {
    %c0_i32 = arith.constant 0 : i32
    %c0_i32_0 = arith.constant 0 : i32
    %c0_i32_1 = arith.constant 0 : i32
    return %c0_i32, %c0_i32_0 : i32, i32
  }
  func.func @transform_3(%arg0: i32) -> (i32, i32) {
    %c0_i32 = arith.constant 0 : i32
    %c0_i32_0 = arith.constant 0 : i32
    %c0_i32_1 = arith.constant 0 : i32
    return %c0_i32, %c0_i32_0 : i32, i32
  }
  func.func @transform_4(%arg0: i32) -> (i32, i32) {
    %c0_i32 = arith.constant 0 : i32
    %c0_i32_0 = arith.constant 0 : i32
    %c0_i32_1 = arith.constant 0 : i32
    return %c0_i32, %c0_i32_0 : i32, i32
  }
  func.func @transform_5(%arg0: i32) -> (i32, i32) {
    %c0_i32 = arith.constant 0 : i32
    %c0_i32_0 = arith.constant 0 : i32
    %c0_i32_1 = arith.constant 0 : i32
    return %c0_i32, %c0_i32_0 : i32, i32
  }
  func.func @transform_6(%arg0: i32) -> (i32, i32) {
    %c0_i32 = arith.constant 0 : i32
    %c0_i32_0 = arith.constant 0 : i32
    %c0_i32_1 = arith.constant 0 : i32
    return %c0_i32, %c0_i32_0 : i32, i32
  }
  func.func @transform_7(%arg0: i32) -> (i32, i32) {
    %c0_i32 = arith.constant 0 : i32
    %c0_i32_0 = arith.constant 0 : i32
    return %arg0, %c0_i32 : i32, i32
  }
}

</mosaic_0001>

<bundles_post_ra>
// kernel: tpu_custom_call.1
= control target key start
LH: loop header
LB: loop body
LE: loop exit
PB: predicated region body
PF: predicated region fallthrough
CT: control target
= control target key end

     0   :  { %vm75_vm0 = vcmask 261120   ;;  %vm165_vm1 = vcmask 523264   ;;  %s532_s1 = inlined_call_operand.vmem [shape: bf16[32,64], index: 1, kind: input, shape index: {}]   ;;  %s533_s2 = inlined_call_operand.vmem [shape: f32[1,64], index: 2, kind: input, shape index: {}]   ;;  %s534_s0 = inlined_call_operand.vmem [shape: bf16[64,32], index: 0, kind: input, shape index: {}]   ;;  %s535_s4 = inlined_call_operand.vmem [shape: f32[1,32], index: 4, kind: input, shape index: {}]   ;;  %s536_s3 = inlined_call_operand.vmem [shape: bf16[64,32], index: 3, kind: input, shape index: {}]   ;;  %s537_s5 = inlined_call_operand.vmem [shape: bf16[32,32], index: 5, kind: input, shape index: {}]   ;;  %s538_s6 = inlined_call_operand.vmem [shape: f32[1,32], index: 6, kind: input, shape index: {}]   ;;  %s539_s7 = inlined_call_operand.vmem [shape: f32[64,32], index: 7, kind: output, shape index: {}]  }
   0x1   :  { %v357_v0 = vld [vmem:[%s532_s1 + $0x8] sm:$0xff]  ;;  %v356_v1 = vld [vmem:[%s532_s1] sm:$0xff]  ;;  %v354_v4 = vld [vmem:[%s534_s0 + $0x10] sm:$0xff] }
   0x2   :  { %94 = vmatpush.bf16.msra.mxu0 %v357_v0  ;;  %v352_v2 = vld [vmem:[%s534_s0] sm:$0xff]  ;;  %v353_v3 = vld [vmem:[%s534_s0 + $0x8] sm:$0xff]  ;;  %v355_v5 = vld [vmem:[%s534_s0 + $0x18] sm:$0xff] }
   0x3   :  { %v361_v6 = vld [vmem:[%s536_s3 + $0x18] sm:$0xff]  ;;  %v360_v7 = vld [vmem:[%s536_s3 + $0x10] sm:$0xff]  ;;  %v359_v8 = vld [vmem:[%s536_s3 + $0x8] sm:$0xff] }
   0x4   :  { %182 = vmatpush.bf16.msra.mxu1 %v361_v6  ;;  %364 = vmatpush.bf16.msra.mxu3 %v361_v6  ;;  %v363_v9 = vld [vmem:[%s537_s5 + $0x8] sm:$0xff]  ;;  %v358_v10 = vld [vmem:[%s536_s3] sm:$0xff] }
   0x5   :  { %238 = vmatpush.bf16.msra.mxu2 %v363_v9  ;;  %v362_v11 = vld [vmem:[%s537_s5] sm:$0xff] }
   0x6   :  { %95 = vmatpush.bf16.msra.mxu0 %v356_v1  ;;  %v368_v13 = vld [vmem:[%s533_s2] ss:$0 sm:$0xff] }
   0x7   :  { %v369_v41 = vld [vmem:[%s535_s4] ss:$0 sm:$0xff] }
   0x8   :  { %183 = vmatpush.bf16.msra.mxu1 %v360_v7  ;;  %365 = vmatpush.bf16.msra.mxu3 %v360_v7  ;;  %v370_v45 = vld [vmem:[%s538_s6] ss:$0 sm:$0xff] }
   0x9   :  { %316 = vmatmul.msk.bf16.vlgmr.msra.gmra.mxu0 %vm75_vm0, %v352_v2  ;;  %239 = vmatpush.bf16.msra.mxu2 %v362_v11 }
   0xc   :  { %184 = vmatpush.bf16.msra.mxu1 %v359_v8  ;;  %366 = vmatpush.bf16.msra.mxu3 %v359_v8 }
   0xd   :  { %348 = vmatmul.msk.bf16.vlgmr.msra.gmra.mxu2 %vm75_vm0, %v352_v2 }
  0x10   :  { %185 = vmatpush.bf16.msra.mxu1 %v358_v10  ;;  %367 = vmatpush.bf16.msra.mxu3 %v358_v10 }
  0x19   :  { %317 = vmatmul.msk.bf16.gmra.mxu0 %vm75_vm0, %v353_v3 }
  0x1d   :  { %349 = vmatmul.msk.bf16.gmra.mxu2 %vm75_vm0, %v353_v3 }
  0x29   :  { %318 = vmatmul.msk.bf16.gmra.mxu0 %vm75_vm0, %v354_v4 }
  0x2d   :  { %350 = vmatmul.msk.bf16.gmra.mxu2 %vm75_vm0, %v354_v4 }
  0x39   :  { %319 = vmatmul.msk.bf16.gmra.mxu0 %vm75_vm0, %v355_v5 }
  0x3d   :  { %351 = vmatmul.msk.bf16.gmra.mxu2 %vm75_vm0, %v355_v5 }
  0x86   :  { %v97_v12 = vpop.f32.mrf.mxu0 }
  0x87   :  { %v98_v14 = vadd.f32 %v368_v13, %v97_v12 }
  0x89   :  { %371 = vtanh.f32 %v98_v14 }
  0x8e   :  { %v99_v15 = vpop.f32.mrf.mxu0 }
  0x8f   :  { %v100_v16 = vadd.f32 %v368_v13, %v99_v15  ;;  %v372_v17 = vpop.eup %371 }
  0x90   :  { %v241_v44 = vpop.f32.mrf.mxu2 }
  0x91   :  { %373 = vtanh.f32 %v100_v16 }
  0x96   :  { %v102_v18 = vpop.f32.mrf.mxu0 }
  0x97   :  { %v374_v19 = vpop.eup %373  ;;  %v103_v21 = vadd.f32 %v368_v13, %v102_v18 }
  0x98   :  { %v125_v20 = vpack.c.bf16 %v374_v19, %v372_v17  ;;  %v243_v50 = vpop.f32.mrf.mxu2 }
  0x99   :  { %375 = vtanh.f32 %v103_v21 }
  0x9a   :  { %336 = vmatmul.msk.bf16.vlgmr.msra.gmra.mxu1 %vm165_vm1, %v125_v20 }
  0x9e   :  { %v104_v22 = vpop.f32.mrf.mxu0 }
  0x9f   :  { %v105_v23 = vadd.f32 %v368_v13, %v104_v22  ;;  %v376_v24 = vpop.eup %375 }
  0xa0   :  { %v246_v55 = vpop.f32.mrf.mxu2 }
  0xa1   :  { %377 = vtanh.f32 %v105_v23 }
  0xa6   :  { %v107_v25 = vpop.f32.mrf.mxu0 }
  0xa7   :  { %v378_v26 = vpop.eup %377  ;;  %v108_v28 = vadd.f32 %v368_v13, %v107_v25 }
  0xa8   :  { %v126_v27 = vpack.c.bf16 %v378_v26, %v376_v24  ;;  %v248_v61 = vpop.f32.mrf.mxu2 }
  0xa9   :  { %379 = vtanh.f32 %v108_v28 }
  0xaa   :  { %337 = vmatmul.msk.bf16.vlgmr.msra.gmra.mxu3 %vm165_vm1, %v126_v27 }
  0xae   :  { %v109_v29 = vpop.f32.mrf.mxu0 }
  0xaf   :  { %v110_v30 = vadd.f32 %v368_v13, %v109_v29  ;;  %v380_v31 = vpop.eup %379 }
  0xb0   :  { %v251_v4 = vpop.f32.mrf.mxu2 }
  0xb1   :  { %381 = vtanh.f32 %v110_v30 }
  0xb6   :  { %v112_v32 = vpop.f32.mrf.mxu0 }
  0xb7   :  { %v382_v33 = vpop.eup %381  ;;  %v113_v35 = vadd.f32 %v368_v13, %v112_v32 }
  0xb8   :  { %v127_v34 = vpack.c.bf16 %v382_v33, %v380_v31  ;;  %v253_v11 = vpop.f32.mrf.mxu2 }
  0xb9   :  { %383 = vtanh.f32 %v113_v35 }
  0xba   :  { %338 = vmatmul.msk.bf16.gmra.mxu3 %vm165_vm1, %v127_v34 }
  0xbe   :  { %v114_v36 = vpop.f32.mrf.mxu0 }
  0xbf   :  { %v115_v37 = vadd.f32 %v368_v13, %v114_v36  ;;  %v384_v38 = vpop.eup %383 }
  0xc0   :  { %v256_v17 = vpop.f32.mrf.mxu2 }
  0xc1   :  { %385 = vtanh.f32 %v115_v37 }
  0xc7   :  { %v386_v39 = vpop.eup %385 }
  0xc8   :  { %v128_v40 = vpack.c.bf16 %v386_v39, %v384_v38  ;;  %v258_v24 = vpop.f32.mrf.mxu2 }
  0xca   :  { %339 = vmatmul.msk.bf16.gmra.mxu3 %vm165_vm1, %v128_v40 }
 0x117   :  { %v187_v42 = vpop.f32.mrf.mxu1 }
 0x118   :  { %v188_v43 = vadd.f32 %v369_v41, %v187_v42 }
 0x11a   :  { %387 = vtanh.f32 %v188_v43 }
 0x11f   :  { %v189_v46 = vpop.f32.mrf.mxu1 }
 0x120   :  { %v388_v47 = vpop.eup %387  ;;  %v190_v48 = vadd.f32 %v369_v41, %v189_v46 }
 0x121   :  { %v261_v49 = vadd.f32 %v388_v47, %v241_v44 }
 0x122   :  { %389 = vtanh.f32 %v190_v48 }
 0x123   :  { %v272_v51 = vadd.f32 %v370_v45, %v261_v49 }
 0x125   :  { %280 = vst.msk [vmem:[%s539_s7] sm:$0xff] %vm75_vm0, %v272_v51 }
 0x128   :  { %v390_v52 = vpop.eup %389 }
 0x129   :  { %v262_v53 = vadd.f32 %v390_v52, %v243_v50 }
 0x12b   :  { %v273_v54 = vadd.f32 %v370_v45, %v262_v53 }
 0x12d   :  { %281 = vst.msk [vmem:[%s539_s7 + $0x8] sm:$0xff] %vm75_vm0, %v273_v54  ;;  %v192_v56 = vpop.f32.mrf.mxu3 }
 0x12e   :  { %v193_v57 = vadd.f32 %v369_v41, %v192_v56 }
 0x130   :  { %391 = vtanh.f32 %v193_v57 }
 0x135   :  { %v194_v58 = vpop.f32.mrf.mxu3 }
 0x136   :  { %v392_v59 = vpop.eup %391  ;;  %v195_v60 = vadd.f32 %v369_v41, %v194_v58 }
 0x137   :  { %v263_v62 = vadd.f32 %v392_v59, %v246_v55 }
 0x138   :  { %393 = vtanh.f32 %v195_v60 }
 0x139   :  { %v274_v63 = vadd.f32 %v370_v45, %v263_v62 }
 0x13b   :  { %282 = vst.msk [vmem:[%s539_s7 + $0x10] sm:$0xff] %vm75_vm0, %v274_v63 }
 0x13d   :  { %v197_v0 = vpop.f32.mrf.mxu3 }
 0x13e   :  { %v394_v1 = vpop.eup %393  ;;  %v198_v2 = vadd.f32 %v369_v41, %v197_v0 }
 0x13f   :  { %v264_v3 = vadd.f32 %v394_v1, %v248_v61 }
 0x140   :  { %395 = vtanh.f32 %v198_v2 }
 0x141   :  { %v275_v5 = vadd.f32 %v370_v45, %v264_v3 }
 0x143   :  { %283 = vst.msk [vmem:[%s539_s7 + $0x18] sm:$0xff] %vm75_vm0, %v275_v5 }
 0x145   :  { %v199_v6 = vpop.f32.mrf.mxu3 }
 0x146   :  { %v396_v7 = vpop.eup %395  ;;  %v200_v8 = vadd.f32 %v369_v41, %v199_v6 }
 0x147   :  { %v265_v9 = vadd.f32 %v396_v7, %v251_v4 }
 0x148   :  { %397 = vtanh.f32 %v200_v8 }
 0x149   :  { %v276_v10 = vadd.f32 %v370_v45, %v265_v9 }
 0x14b   :  { %284 = vst.msk [vmem:[%s539_s7 + $0x20] sm:$0xff] %vm75_vm0, %v276_v10 }
 0x14d   :  { %v202_v12 = vpop.f32.mrf.mxu3 }
 0x14e   :  { %v398_v13 = vpop.eup %397  ;;  %v203_v14 = vadd.f32 %v369_v41, %v202_v12 }
 0x14f   :  { %v266_v15 = vadd.f32 %v398_v13, %v253_v11 }
 0x150   :  { %399 = vtanh.f32 %v203_v14 }
 0x151   :  { %v277_v16 = vadd.f32 %v370_v45, %v266_v15 }
 0x153   :  { %285 = vst.msk [vmem:[%s539_s7 + $0x28] sm:$0xff] %vm75_vm0, %v277_v16 }
 0x155   :  { %v204_v18 = vpop.f32.mrf.mxu3 }
 0x156   :  { %v400_v19 = vpop.eup %399  ;;  %v205_v20 = vadd.f32 %v369_v41, %v204_v18 }
 0x157   :  { %v267_v21 = vadd.f32 %v400_v19, %v256_v17 }
 0x158   :  { %401 = vtanh.f32 %v205_v20 }
 0x159   :  { %v278_v22 = vadd.f32 %v370_v45, %v267_v21 }
 0x15b   :  { %286 = vst.msk [vmem:[%s539_s7 + $0x30] sm:$0xff] %vm75_vm0, %v278_v22 }
 0x15e   :  { %v402_v23 = vpop.eup %401 }
 0x15f   :  { %v268_v25 = vadd.f32 %v402_v23, %v258_v24 }
 0x161   :  { %v279_v26 = vadd.f32 %v370_v45, %v268_v25 }
 0x163   :  { %287 = vst.msk [vmem:[%s539_s7 + $0x38] sm:$0xff] %vm75_vm0, %v279_v26 }

</bundles_post_ra>
